<compile_context>
chip_gen: v5e
topology: v5e:2x2
jax: 0.10.0
libtpu: 0.0.40
codegen_flags: <defaults>
</compile_context>

<pallas_src>
import functools
import math

import jax
import jax.numpy as jnp
from jax.experimental import pallas as pl
from jax.experimental.pallas import tpu as pltpu

_MASK = -1e30  # finite "minus infinity" for padded class lanes


def _round_up(n, m):
    return ((n + m - 1) // m) * m


def _batch_tiling(B):
    """Pick (tile_rows, padded_batch).

    Small batches: one tile (block == full array, no (8,128) issue).
    Large batches: >=2 grid steps (v7x megacore), <=2048-row tiles, tile size
    ~ ceil(B / n_steps) so padding waste stays < 16 rows in common cases.
    """
    if B <= 256:
        tb = _round_up(B, 8)
        return tb, tb
    n_steps = max(2, math.ceil(B / 2048))
    tb = _round_up(math.ceil(B / n_steps), 16)  # 16: bf16 sublane tile safe
    return tb, _round_up(B, tb)


def _mlp_logits(dout, x_ref, w1_ref, b1_ref, w2_ref, b2_ref):
    """Shared body: f32 x -> bf16 MXU matmuls (f32 acc) -> masked f32 logits."""
    xb = x_ref[...].astype(jnp.bfloat16)            # cast in-kernel (VPU, free)
    h = jnp.dot(xb, w1_ref[...], preferred_element_type=jnp.float32)
    h = jnp.maximum(h + b1_ref[...], 0.0)           # bias + ReLU in f32
    logits = jnp.dot(h.astype(jnp.bfloat16), w2_ref[...],
                     preferred_element_type=jnp.float32) + b2_ref[...]
    if dout != logits.shape[-1]:
        lane = jax.lax.broadcasted_iota(jnp.int32, logits.shape, 1)
        logits = jnp.where(lane < dout, logits, _MASK)  # kill padded lanes
    return logits


def _mlp_softmax_kernel(dout, x_ref, w1_ref, b1_ref, w2_ref, b2_ref, probs_ref):
    """Inference: fused MLP -> numerically stable softmax -> bf16 store."""
    logits = _mlp_logits(dout, x_ref, w1_ref, b1_ref, w2_ref, b2_ref)
    m = jnp.max(logits, axis=-1, keepdims=True)
    e = jnp.exp(logits - m)                          # padded lanes -> exactly 0
    denom = jnp.sum(e, axis=-1, keepdims=True)
    probs = e * pl.reciprocal(denom, approx=True)    # EUP slot, ~free
    probs_ref[...] = probs.astype(probs_ref.dtype)   # single pack-on-store

def _mlp_ce_kernel(dout, x_ref, y_ref, w1_ref, b1_ref, w2_ref, b2_ref, loss_ref):
    """Training: fused MLP -> log-softmax -> per-row -log p_y (f32, (TB,1))."""
    logits = _mlp_logits(dout, x_ref, w1_ref, b1_ref, w2_ref, b2_ref)
    m = jnp.max(logits, axis=-1, keepdims=True)
    z = logits - m
    lse = jnp.log(jnp.sum(jnp.exp(z), axis=-1, keepdims=True))
    logp = z - lse                                   # log-softmax, f32
    lane = jax.lax.broadcasted_iota(jnp.int32, logits.shape, 1)
    onehot = lane == y_ref[...]                      # (TB,1) int32 broadcast
    loss_ref[...] = jnp.sum(jnp.where(onehot, -logp, 0.0),
                            axis=-1, keepdims=True)


def prepare_params(w1, b1, w2, b2):
    """One-time weight prep (call ONCE, not per forward): bf16 MXU operands
    and class-axis padding to a lane-dense multiple of 128."""
    H, dout = w2.shape
    dp = _round_up(dout, 128)
    w2p = jnp.zeros((H, dp), jnp.float32).at[:, :dout].set(w2)
    b2p = jnp.zeros((1, dp), jnp.float32).at[:, :dout].set(b2)
    return {
        "w1": w1.astype(jnp.bfloat16),
        "b1": b1.reshape(1, -1).astype(jnp.float32),
        "w2": w2p.astype(jnp.bfloat16),
        "b2": b2p,                # bias stays f32 (v5e: no bf16 VPU)
        "dout": dout,
    }


def torch_model_forward(x, params, y=None):
    """Pallas implementation of TorchModel.forward.

    y is None  -> softmax probabilities (bf16), shape (B, output_size).
    y provided -> mean cross-entropy loss (nn.CrossEntropyLoss semantics,
                  reduction='mean'), computed fully in-kernel.
    """
    B, Din = x.shape
    w1, b1, w2p, b2p = params["w1"], params["b1"], params["w2"], params["b2"]
    dout = params["dout"]
    H = w1.shape[1]
    DP = w2p.shape[1]

    TB, Bp = _batch_tiling(B)
    xp = x if Bp == B else jnp.pad(x, ((0, Bp - B), (0, 0)))
    grid = (Bp // TB,)

    weight_specs = [
        pl.BlockSpec((Din, H), lambda i: (0, 0)),    # W1 resident
        pl.BlockSpec((1, H), lambda i: (0, 0)),      # b1 resident
        pl.BlockSpec((H, DP), lambda i: (0, 0)),     # W2 (lane-padded) resident
        pl.BlockSpec((1, DP), lambda i: (0, 0)),     # b2 (lane-padded) resident
    ]
    cparams = pltpu.CompilerParams(
        dimension_semantics=("parallel",))           # megacore on v7x

    if y is None:
        probs = pl.pallas_call(
            functools.partial(_mlp_softmax_kernel, dout),
            out_shape=jax.ShapeDtypeStruct((Bp, DP), jnp.bfloat16),
            grid=grid,
            in_specs=[pl.BlockSpec((TB, Din), lambda i: (i, 0))] + weight_specs,
            out_specs=pl.BlockSpec((TB, DP), lambda i: (i, 0)),
            compiler_params=cparams,
        )(xp, w1, b1, w2p, b2p)
        return probs[:B, :dout]

    yp = y.astype(jnp.int32).reshape(B, 1)
    if Bp != B:
        yp = jnp.pad(yp, ((0, Bp - B), (0, 0)))
    per_row_loss = pl.pallas_call(
        functools.partial(_mlp_ce_kernel, dout),
        out_shape=jax.ShapeDtypeStruct((Bp, 1), jnp.float32),
        grid=grid,
        in_specs=[pl.BlockSpec((TB, Din), lambda i: (i, 0)),
                  pl.BlockSpec((TB, 1), lambda i: (i, 0))] + weight_specs,
        out_specs=pl.BlockSpec((TB, 1), lambda i: (i, 0)),
        compiler_params=cparams,
    )(xp, yp, w1, b1, w2p, b2p)
    return jnp.mean(per_row_loss[:B, 0])


def init_params(key, input_size, hidden_size, output_size):
    # PyTorch-style U(-1/sqrt(fan_in), 1/sqrt(fan_in)) init.
    k1, k2, k3, k4 = jax.random.split(key, 4)
    bound1 = 1.0 / jnp.sqrt(input_size)
    bound2 = 1.0 / jnp.sqrt(hidden_size)
    w1 = jax.random.uniform(k1, (input_size, hidden_size), jnp.float32,
                            -bound1, bound1)
    b1 = jax.random.uniform(k2, (1, hidden_size), jnp.float32, -bound1, bound1)
    w2 = jax.random.uniform(k3, (hidden_size, output_size), jnp.float32,
                            -bound2, bound2)
    b2 = jax.random.uniform(k4, (1, output_size), jnp.float32, -bound2, bound2)
    return w1, b1, w2, b2


def _reference(x, w1, b1, w2, b2, y=None):
    h = jnp.maximum(x @ w1 + b1, 0.0)
    logits = h @ w2 + b2
    if y is None:
        return jax.nn.softmax(logits, axis=-1)
    logp = jax.nn.log_softmax(logits, axis=-1)
    return -jnp.mean(jnp.take_along_axis(logp, y[:, None], axis=-1))


if __name__ == "__main__":
    key = jax.random.PRNGKey(0)
    kx, ky, kp = jax.random.split(key, 3)

    batch, input_size, hidden_size, output_size = 8, 32, 64, 8

    x = jax.random.normal(kx, (batch, input_size), jnp.float32)
    y = jax.random.randint(ky, (batch,), 0, output_size, jnp.int32)
    w1, b1, w2, b2 = init_params(kp, input_size, hidden_size, output_size)

    # One-time weight prep hoisted out of the per-call path.
    params = prepare_params(w1, b1, w2, b2)

    # Inference path: softmax probabilities (bf16).
    probs = jax.block_until_ready(torch_model_forward(x, params))
    # Training path: fused mean cross-entropy loss.
    loss = jax.block_until_ready(torch_model_forward(x, params, y))

    # Sanity vs. pure-JAX f32 reference (bf16 operands/output tolerance).
    probs_ref = _reference(x, w1, b1, w2, b2)
    loss_ref = _reference(x, w1, b1, w2, b2, y)

    assert probs.shape == (batch, output_size)
    probs_f32 = probs.astype(jnp.float32)
    assert bool(jnp.all(jnp.abs(jnp.sum(probs_f32, axis=1) - 1.0) < 2e-2))
    assert bool(jnp.all(jnp.abs(probs_f32 - probs_ref) < 3e-2))
    assert bool(jnp.isfinite(loss))
    assert bool(jnp.abs(loss - loss_ref) < 5e-2)

    print("KERNEL_OK")
</pallas_src>

<mosaic_0001>
module attributes {stable_mosaic.version = 11 : i64} {
  func.func @_mlp_softmax_kernel(%arg0: i32, %arg1: memref<8x32xf32, #tpu.memory_space<vmem>>, %arg2: memref<32x64xbf16, #tpu.memory_space<vmem>>, %arg3: memref<1x64xf32, #tpu.memory_space<vmem>>, %arg4: memref<64x128xbf16, #tpu.memory_space<vmem>>, %arg5: memref<1x128xf32, #tpu.memory_space<vmem>>, %arg6: memref<8x128xbf16, #tpu.memory_space<vmem>>) attributes {dimension_semantics = [#tpu.dimension_semantics<parallel>], iteration_bounds = array<i64: 1>, scalar_prefetch = 0 : i64, scratch_operands = 0 : i64, tpu.core_type = #tpu.core_type<tc>, window_params = [{transform_indices = @transform_0, window_bounds = array<i64: 8, 32>}, {pipeline_mode = #tpu.pipeline_mode<synchronous>, transform_indices = @transform_1, window_bounds = array<i64: 32, 64>}, {pipeline_mode = #tpu.pipeline_mode<synchronous>, transform_indices = @transform_2, window_bounds = array<i64: 1, 64>}, {pipeline_mode = #tpu.pipeline_mode<synchronous>, transform_indices = @transform_3, window_bounds = array<i64: 64, 128>}, {pipeline_mode = #tpu.pipeline_mode<synchronous>, transform_indices = @transform_4, window_bounds = array<i64: 1, 128>}, {transform_indices = @transform_5, window_bounds = array<i64: 8, 128>}]} {
    %c0 = arith.constant 0 : index
    %c0_0 = arith.constant 0 : index
    %0 = vector.load %arg1[%c0, %c0_0] : memref<8x32xf32, #tpu.memory_space<vmem>>, vector<8x32xf32>
    %1 = arith.truncf %0 : vector<8x32xf32> to vector<8x32xbf16>
    %c0_1 = arith.constant 0 : index
    %c0_2 = arith.constant 0 : index
    %2 = vector.load %arg2[%c0_1, %c0_2] : memref<32x64xbf16, #tpu.memory_space<vmem>>, vector<32x64xbf16>
    %cst = arith.constant dense<0.000000e+00> : vector<8x64xf32>
    %3 = tpu.matmul %1, %2, %cst {dimension_numbers = #tpu.dot_dimension_numbers<[1], [0], [0], [1], [0, 0, 1, 1], [], []>} : vector<8x32xbf16>, vector<32x64xbf16>, vector<8x64xf32> -> vector<8x64xf32>
    %c0_3 = arith.constant 0 : index
    %c0_4 = arith.constant 0 : index
    %4 = vector.load %arg3[%c0_3, %c0_4] : memref<1x64xf32, #tpu.memory_space<vmem>>, vector<1x64xf32>
    %5 = vector.broadcast %4 : vector<1x64xf32> to vector<8x64xf32>
    %6 = arith.addf %3, %5 : vector<8x64xf32>
    %cst_5 = arith.constant 0.000000e+00 : f32
    %7 = vector.broadcast %cst_5 : f32 to vector<8x64xf32>
    %8 = arith.maximumf %6, %7 : vector<8x64xf32>
    %9 = arith.truncf %8 : vector<8x64xf32> to vector<8x64xbf16>
    %c0_6 = arith.constant 0 : index
    %c0_7 = arith.constant 0 : index
    %10 = vector.load %arg4[%c0_6, %c0_7] : memref<64x128xbf16, #tpu.memory_space<vmem>>, vector<64x128xbf16>
    %cst_8 = arith.constant dense<0.000000e+00> : vector<8x128xf32>
    %11 = tpu.matmul %9, %10, %cst_8 {dimension_numbers = #tpu.dot_dimension_numbers<[1], [0], [0], [1], [0, 0, 1, 1], [], []>} : vector<8x64xbf16>, vector<64x128xbf16>, vector<8x128xf32> -> vector<8x128xf32>
    %c0_9 = arith.constant 0 : index
    %c0_10 = arith.constant 0 : index
    %12 = vector.load %arg5[%c0_9, %c0_10] : memref<1x128xf32, #tpu.memory_space<vmem>>, vector<1x128xf32>
    %13 = vector.broadcast %12 : vector<1x128xf32> to vector<8x128xf32>
    %14 = arith.addf %11, %13 : vector<8x128xf32>
    %15 = tpu.iota {dimensions = array<i32: 1>} : vector<8x128xi32>
    %c8_i32 = arith.constant 8 : i32
    %16 = vector.broadcast %c8_i32 : i32 to vector<8x128xi32>
    %17 = arith.cmpi slt, %15, %16 : vector<8x128xi32>
    %cst_11 = arith.constant -1.000000e+30 : f32
    %18 = vector.broadcast %cst_11 : f32 to vector<8x128xf32>
    %19 = arith.select %17, %14, %18 : vector<8x128xi1>, vector<8x128xf32>
    %cst_12 = arith.constant dense<0xFF800000> : vector<8xf32>
    %20 = vector.multi_reduction <maximumf>, %19, %cst_12 [1] : vector<8x128xf32> to vector<8xf32>
    %21 = vector.shape_cast %20 : vector<8xf32> to vector<8x1xf32>
    %22 = vector.broadcast %21 : vector<8x1xf32> to vector<8x128xf32>
    %23 = arith.subf %19, %22 : vector<8x128xf32>
    %24 = math.exp %23 : vector<8x128xf32>
    %cst_13 = arith.constant dense<0.000000e+00> : vector<8xf32>
    %25 = vector.multi_reduction <add>, %24, %cst_13 [1] : vector<8x128xf32> to vector<8xf32>
    %26 = vector.shape_cast %25 : vector<8xf32> to vector<8x1xf32>
    %27 = tpu.reciprocal %26 {approx = true} : vector<8x1xf32> -> vector<8x1xf32>
    %28 = vector.broadcast %27 : vector<8x1xf32> to vector<8x128xf32>
    %29 = arith.mulf %24, %28 : vector<8x128xf32>
    %30 = arith.truncf %29 : vector<8x128xf32> to vector<8x128xbf16>
    %c0_14 = arith.constant 0 : index
    %c0_15 = arith.constant 0 : index
    %31 = vector.load %arg6[%c0_14, %c0_15] : memref<8x128xbf16, #tpu.memory_space<vmem>>, vector<8x128xbf16>
    tpu.vector_store %arg6[%c0_14, %c0_15], %30 {strides = array<i32>} : memref<8x128xbf16, #tpu.memory_space<vmem>>, vector<8x128xbf16>,
    return
  }
  func.func @transform_0(%arg0: i32) -> (i32, i32) {
    %c0_i32 = arith.constant 0 : i32
    %c0_i32_0 = arith.constant 0 : i32
    return %arg0, %c0_i32 : i32, i32
  }
  func.func @transform_1(%arg0: i32) -> (i32, i32) {
    %c0_i32 = arith.constant 0 : i32
    %c0_i32_0 = arith.constant 0 : i32
    %c0_i32_1 = arith.constant 0 : i32
    return %c0_i32, %c0_i32_0 : i32, i32
  }
  func.func @transform_2(%arg0: i32) -> (i32, i32) {
    %c0_i32 = arith.constant 0 : i32
    %c0_i32_0 = arith.constant 0 : i32
    %c0_i32_1 = arith.constant 0 : i32
    return %c0_i32, %c0_i32_0 : i32, i32
  }
  func.func @transform_3(%arg0: i32) -> (i32, i32) {
    %c0_i32 = arith.constant 0 : i32
    %c0_i32_0 = arith.constant 0 : i32
    %c0_i32_1 = arith.constant 0 : i32
    return %c0_i32, %c0_i32_0 : i32, i32
  }
  func.func @transform_4(%arg0: i32) -> (i32, i32) {
    %c0_i32 = arith.constant 0 : i32
    %c0_i32_0 = arith.constant 0 : i32
    %c0_i32_1 = arith.constant 0 : i32
    return %c0_i32, %c0_i32_0 : i32, i32
  }
  func.func @transform_5(%arg0: i32) -> (i32, i32) {
    %c0_i32 = arith.constant 0 : i32
    %c0_i32_0 = arith.constant 0 : i32
    return %arg0, %c0_i32 : i32, i32
  }
}

</mosaic_0001>

<bundles_post_ra>
// kernel: tpu_custom_call.1
= control target key start
LH: loop header
LB: loop body
LE: loop exit
PB: predicated region body
PF: predicated region fallthrough
CT: control target
= control target key end

     0   :  { %10 = vsyncpa [#allocation3], 0  ;;  %s394_s0 = inlined_call_operand.hbm [shape: f32[8,32], index: 0, kind: input, shape index: {}]   ;;  %s395_s1 = inlined_call_operand.hbm [shape: bf16[32,64], index: 1, kind: input, shape index: {}]   ;;  %s396_s2 = inlined_call_operand.vmem [shape: f32[1,64], index: 2, kind: input, shape index: {}]   ;;  %s397_s3 = inlined_call_operand.hbm [shape: bf16[64,128], index: 3, kind: input, shape index: {}]   ;;  %s398_s4 = inlined_call_operand.vmem [shape: f32[1,128], index: 4, kind: input, shape index: {}]   ;;  %s399_s5 = inlined_call_operand.hbm [shape: bf16[8,128], index: 5, kind: output, shape index: {}]  }
   0x1   :  { %11 = vsyncpa [#allocation6], 0  ;;  %s28_s20 = sshll.u32 %s395_s1, 4  ;;  %s29_s20 = int_to_ptr.hbm [resolvable:$true] %s28_s20 }
   0x2   :  { %12 = vsyncpa [#allocation4], 0  ;;  %s340_s21 = smov [#allocation5]   ;;  %s18_s25 = sshll.u32 %s394_s0, 4  ;;  %s19_s25 = int_to_ptr.hbm [resolvable:$true] %s18_s25 }
   0x3   :  { %s30_s22 = sshll.u32 %s340_s21, 4  ;;  %s341_s26 = smov 64   ;;  %s31_s22 = int_to_ptr.vmem [resolvable:$true] %s30_s22 }
   0x4   :  { %s342_s27 = smov 4   ;;  %s343_s28 = smov [#allocation2]  }
   0x5   :  { %36 = dma.hbm_to_vmem [thread:$0]  %s29_s20, 256, %s31_s22, [#allocation6], %s341_s26, %s341_s26, %s342_s27  }
   0x6   :  { %s20_s29 = sshll.u32 %s343_s28, 4  ;;  %s43_s7 = sshll.u32 %s397_s3, 4  ;;  %s21_s29 = int_to_ptr.vmem [resolvable:$true] %s20_s29  ;;  %s44_s7 = int_to_ptr.hbm [resolvable:$true] %s43_s7 }
   0x7   :  { %23 = dma.hbm_to_vmem [thread:$0]  %s19_s25, 128, %s21_s29, [#allocation3]  }
   0x8   :  { %s344_s1 = smov [#allocation7]  }
   0x9   :  { %s45_s8 = sshll.u32 %s344_s1, 4  ;;  %s46_s8 = int_to_ptr.vmem [resolvable:$true] %s45_s8 }
   0xa   :  { %51 = dma.hbm_to_vmem [thread:$0]  %s44_s7, 512, %s46_s8, [#allocation6], %s341_s26, %s341_s26, %s342_s27  }
   0xb   :  { %334 = dma.done.wait [#allocation3], 128  }
   0xc   :  { %335 = vsyncadd [#allocation3], 4294967168 }
   0xd   :  { %336 = dma.done.wait [#allocation6], 768  }
   0xe   :  { %337 = vsyncadd [#allocation6], 4294966528  ;;  %v221_v0 = vld [vmem:[#allocation5 + $0x8] sm:$0xff]  ;;  %v220_v2 = vld [vmem:[#allocation5] sm:$0xff]  ;;  %vm89_vm0 = vcmask 261120   ;;  %vm144_vm1 = vcmask 523264   ;;  %v161_v14 = vlaneseq }
   0xf   :  { %v225_v1 = vld [vmem:[#allocation7 + $0x18] sm:$0xff]  ;;  %99 = vmatpush.bf16.msra.mxu0 %v221_v0  ;;  %v67_v3 = vld [vmem:[#allocation2] sm:$0xff]  ;;  %v224_v4 = vld [vmem:[#allocation7 + $0x10] sm:$0xff] }
  0x10   :  { %152 = vmatpush.bf16.msra.mxu1 %v225_v1  ;;  %v68_v5 = vpack.c.bf16 %v67_v3, %v67_v3  ;;  %v223_v6 = vld [vmem:[#allocation7 + $0x8] sm:$0xff]  ;;  %v222_v7 = vld [vmem:[#allocation7] sm:$0xff]  ;;  %v162_v15 = vand.u32 127, %v161_v14 }
  0x11   :  { %v232_v8 = vld [vmem:[%s396_s2] ss:$0 sm:$0xff]  ;;  %s345_s2 = smov [#allocation8]  }
  0x12   :  { %v233_v16 = vld [vmem:[%s398_s4] ss:$0 sm:$0xff]  ;;  %vm163_vm2 = vcmp.lt.s32.totalorder %v162_v15, 8  ;;  %s181_s11 = sshll.u32 %s345_s2, 4  ;;  %s183_s4 = sshll.u32 %s399_s5, 4  ;;  %s182_s11 = int_to_ptr.vmem [resolvable:$true] %s181_s11  ;;  %s184_s4 = int_to_ptr.hbm [resolvable:$true] %s183_s4 }
  0x13   :  { %100 = vmatpush.bf16.msra.mxu0 %v220_v2 }
  0x14   :  { %153 = vmatpush.bf16.msra.mxu1 %v224_v4 }
  0x16   :  { %202 = vmatmul.msk.bf16.vlgmr.msra.gmra.mxu0 %vm89_vm0, %v68_v5 }
  0x18   :  { %154 = vmatpush.bf16.msra.mxu1 %v223_v6 }
  0x1c   :  { %155 = vmatpush.bf16.msra.mxu1 %v222_v7 }
  0x93   :  { %v102_v9 = vpop.f32.mrf.mxu0 }
  0x94   :  { %v103_v10 = vadd.f32 %v232_v8, %v102_v9 }
  0x96   :  { %v106_v11 = vmax.f32 %v103_v10, 0.0 }
  0x98   :  { %v107_v12 = vpack.c.bf16 %v106_v11, %v106_v11 }
  0x9a   :  { %219 = vmatmul.msk.bf16.vlgmr.msra.gmra.mxu1 %vm144_vm1, %v107_v12 }
  0x9b   :  { %v104_v13 = vpop.f32.mrf.mxu0 }
 0x117   :  { %v157_v17 = vpop.f32.mrf.mxu1 }
 0x118   :  { %v158_v18 = vadd.f32 %v233_v16, %v157_v17 }
 0x11a   :  { %v164_v19 = vsel %vm163_vm2, %v158_v18, -1e+30 }
 0x11b   :  { %165 = vmax.xlane.f32.xlu0 %v164_v19 }
 0x11f   :  { %v159_v20 = vpop.f32.mrf.mxu1 }
 0x18e   :  { %v166_v21 = vpop.xlane.xlu0 %165 }
 0x18f   :  { %v167_v22 = vsub.f32 %v164_v19, %v166_v21 }
 0x191   :  { %v168_v23 = vmul.f32 1.442695, %v167_v22 }
 0x193   :  { %234 = vpow2.f32 %v168_v23 }
 0x199   :  { %v235_v24 = vpop.eup %234 }
 0x19a   :  { %170 = vadd.xlane.f32.xlu0 %v235_v24 }
 0x20d   :  { %v171_v25 = vpop.xlane.xlu0 %170 }
 0x20e   :  { %236 = vrcp.f32 %v171_v25 }
 0x214   :  { %v237_v26 = vpop.eup %236 }
 0x215   :  { %v173_v27 = vmul.f32 %v237_v26, %v235_v24 }
 0x217   :  { %v174_v28 = vpack.c.bf16 %v173_v27, %v173_v27 }
 0x219   :  { %175 = vst [vmem:[#allocation8] sm:$0xf] %v174_v28 }
 0x21a   :  { %186 = dma.vmem_to_hbm [thread:$0]  %s182_s11, 64, %s184_s4, [#allocation4]  }
 0x21b   :  { %338 = dma.done.wait [#allocation4], 64  }
 0x21c   :  { %339 = vsyncadd [#allocation4], 4294967232 }
 0x21d   :  { %191 = vsyncpa [#allocation3], 1 }
 0x21e   :  { %192 = vsyncpa [#allocation6], 1 }
 0x21f   :  { %193 = vsyncpa [#allocation4], 1 }

</bundles_post_ra>
